<compile_context>
chip_gen: v7x
topology: tpu7x:2x2x1
jax: 0.10.0
libtpu: 0.0.40
codegen_flags: <defaults>
</compile_context>

<pallas_src>
from functools import partial

import jax
import jax.numpy as jnp
from jax import lax
from jax.experimental import pallas as pl
from jax.experimental.pallas import tpu as pltpu


def _instnce_kernel(q_ref, k_ref, loss_ref, *, nce_T, pos_from_diag):
    q = q_ref[0]                      # (G, P, D) in the input dtype (bf16 ok)
    k = k_ref[0]                      # (G, P, D)  (feat_k.detach(): fwd identical)
    G, P, _ = q.shape
    inv_T = jnp.float32(1.0 / nce_T)

    # Negative logits: batched contraction of the last dim of both operands
    # (no explicit transpose), f32 accumulation on the MXU.
    s = jnp.einsum('gpd,gqd->gpq', q, k,
                   preferred_element_type=jnp.float32)                # (G, P, P)

    row = lax.broadcasted_iota(jnp.int32, (G, P, P), 1)
    col = lax.broadcasted_iota(jnp.int32, (G, P, P), 2)
    diag = row == col

    if pos_from_diag:
        # Positive logit == diagonal of q @ k^T: reuse the MXU result.
        l_pos = jnp.sum(jnp.where(diag, s, jnp.float32(0.0)),
                        axis=-1, keepdims=True)                        # (G, P, 1)
    else:
        # Cheaper on the VPU when dim < P.
        l_pos = jnp.sum(q.astype(jnp.float32) * k.astype(jnp.float32),
                        axis=-1, keepdims=True)                        # (G, P, 1)

    # masked_fill_(eye, -10.0)
    l_neg = jnp.where(diag, jnp.float32(-10.0), s)                     # (G, P, P)

    out_pos = l_pos * inv_T                                            # (G, P, 1)
    out_neg = l_neg * inv_T                                            # (G, P, P)

    # CrossEntropy(reduction='none') with target 0:
    #   loss = logsumexp([out_pos, out_neg_row]) - out_pos
    m = jnp.maximum(out_pos, jnp.max(out_neg, axis=-1, keepdims=True))
    sum_exp = jnp.exp(out_pos - m) + jnp.sum(jnp.exp(out_neg - m),
                                             axis=-1, keepdims=True)
    lse = m + jnp.log(sum_exp)
    loss = jnp.squeeze(lse - out_pos, axis=-1)                         # (G, P)
    loss_ref[0] = loss.astype(loss_ref.dtype)


def _pick_groups_per_step(B, P, dim, itemsize):
    """Largest divisor G of B whose working set fits a conservative VMEM budget,
    preferring G with B // G >= 2 so the grid can shard across 2 TensorCores."""
    budget = 8 << 20   # leave plenty of headroom under the default scoped VMEM
    def fits(g):
        in_bytes = 4 * g * P * dim * itemsize      # 2 inputs x 2 pipeline bufs
        out_bytes = 2 * g * P * 4                  # double-buffered f32 output
        logits_bytes = 4 * g * P * P * 4           # logits + elementwise temps
        return in_bytes + out_bytes + logits_bytes <= budget
    divs = [g for g in range(1, B + 1) if B % g == 0 and fits(g)]
    if not divs:
        divs = [1]
    if B >= 2:
        pref = [g for g in divs if B // g >= 2]
        if pref:
            divs = pref
    return max(divs)


def instnce_loss(feat_q, feat_k, *, nce_T=0.07, batch_size=2,
                 nce_includes_all_negatives_from_minibatch=False,
                 use_box=False):
    batchSize, dim = feat_q.shape

    if nce_includes_all_negatives_from_minibatch or use_box:
        B = 1
    else:
        B = batch_size
    assert batchSize % B == 0, (
        f"batchSize={batchSize} must be divisible by batch_dim_for_bmm={B}")
    P = batchSize // B                         # npatches per bmm group

    itemsize = jnp.dtype(feat_q.dtype).itemsize
    G = _pick_groups_per_step(B, P, dim, itemsize)
    NB = B // G

    q4 = feat_q.reshape(NB, G, P, dim)
    k4 = feat_k.reshape(NB, G, P, dim)

    cost = pl.CostEstimate(
        flops=2 * B * P * P * dim,
        transcendentals=B * P * (P + 1),
        bytes_accessed=2 * batchSize * dim * itemsize + batchSize * 4,
    )

    loss = pl.pallas_call(
        partial(_instnce_kernel, nce_T=float(nce_T), pos_from_diag=(dim >= P)),
        out_shape=jax.ShapeDtypeStruct((NB, G, P), jnp.float32),
        grid_spec=pltpu.PrefetchScalarGridSpec(
            num_scalar_prefetch=0,
            grid=(NB,),
            in_specs=[pl.BlockSpec((1, G, P, dim), lambda i: (i, 0, 0, 0)),
                      pl.BlockSpec((1, G, P, dim), lambda i: (i, 0, 0, 0))],
            out_specs=pl.BlockSpec((1, G, P), lambda i: (i, 0, 0)),
        ),
        compiler_params=pltpu.CompilerParams(
            dimension_semantics=("parallel",)),
        cost_estimate=cost,
    )(q4, k4)

    return loss.reshape(batchSize)


def _reference(feat_q, feat_k, *, nce_T, batch_size,
               nce_includes_all_negatives_from_minibatch=False,
               use_box=False):
    """Pure-JAX (f32, highest precision) re-implementation of the PyTorch forward."""
    feat_q = feat_q.astype(jnp.float32)
    feat_k = feat_k.astype(jnp.float32)
    batchSize, dim = feat_q.shape
    l_pos = jnp.sum(feat_q * feat_k, axis=-1, keepdims=True)
    B = 1 if (nce_includes_all_negatives_from_minibatch or use_box) else batch_size
    q = feat_q.reshape(B, -1, dim)
    k = feat_k.reshape(B, -1, dim)
    P = q.shape[1]
    l_neg = jnp.einsum('bpd,bqd->bpq', q, k, precision=lax.Precision.HIGHEST)
    eye = jnp.eye(P, dtype=bool)[None]
    l_neg = jnp.where(eye, -10.0, l_neg).reshape(-1, P)
    out = jnp.concatenate([l_pos, l_neg], axis=1) / nce_T
    return jax.nn.logsumexp(out, axis=1) - out[:, 0]


if __name__ == "__main__":
    key = jax.random.PRNGKey(0)
    kq, kk = jax.random.split(key)

    # batchSize = 16 feature rows (2 minibatch items x 8 patches), dim = 32.
    # bf16 features exercise the native-MXU fast path.
    batchSize, dim = 16, 32
    feat_q = jax.random.normal(kq, (batchSize, dim), jnp.float32).astype(jnp.bfloat16)
    feat_k = jax.random.normal(kk, (batchSize, dim), jnp.float32).astype(jnp.bfloat16)

    # Standard path: B = batch_size groups.
    loss = instnce_loss(feat_q, feat_k, nce_T=0.07, batch_size=2)
    loss = jax.block_until_ready(loss)
    ref = _reference(feat_q, feat_k, nce_T=0.07, batch_size=2)
    assert loss.shape == (batchSize,)
    assert jnp.allclose(loss, ref, rtol=1e-4, atol=1e-4), (loss, ref)

    # "All negatives from minibatch" path: single group of 16 patches.
    loss2 = instnce_loss(feat_q, feat_k, nce_T=0.07, batch_size=2,
                         nce_includes_all_negatives_from_minibatch=True)
    loss2 = jax.block_until_ready(loss2)
    ref2 = _reference(feat_q, feat_k, nce_T=0.07, batch_size=2,
                      nce_includes_all_negatives_from_minibatch=True)
    assert loss2.shape == (batchSize,)
    assert jnp.allclose(loss2, ref2, rtol=1e-4, atol=1e-4), (loss2, ref2)

    print("KERNEL_OK")
</pallas_src>

<mosaic_0001>
module attributes {stable_mosaic.version = 11 : i64} {
  func.func @_instnce_kernel(%arg0: i32, %arg1: memref<1x1x8x32xbf16, #tpu.memory_space<vmem>>, %arg2: memref<1x1x8x32xbf16, #tpu.memory_space<vmem>>, %arg3: memref<1x1x8xf32, #tpu.memory_space<vmem>>) attributes {dimension_semantics = [#tpu.dimension_semantics<parallel>], iteration_bounds = array<i64: 2>, scalar_prefetch = 0 : i64, scratch_operands = 0 : i64, tpu.core_type = #tpu.core_type<tc>, window_params = [{transform_indices = @transform_0, window_bounds = array<i64: 1, 1, 8, 32>}, {transform_indices = @transform_1, window_bounds = array<i64: 1, 1, 8, 32>}, {transform_indices = @transform_2, window_bounds = array<i64: 1, 1, 8>}]} {
    %c0 = arith.constant 0 : index
    %c0_0 = arith.constant 0 : index
    %c0_1 = arith.constant 0 : index
    %c0_2 = arith.constant 0 : index
    %0 = vector.load %arg1[%c0, %c0_0, %c0_1, %c0_2] : memref<1x1x8x32xbf16, #tpu.memory_space<vmem>>, vector<1x1x8x32xbf16>
    %1 = vector.shape_cast %0 : vector<1x1x8x32xbf16> to vector<1x8x32xbf16>
    %c0_3 = arith.constant 0 : index
    %c0_4 = arith.constant 0 : index
    %c0_5 = arith.constant 0 : index
    %c0_6 = arith.constant 0 : index
    %2 = vector.load %arg2[%c0_3, %c0_4, %c0_5, %c0_6] : memref<1x1x8x32xbf16, #tpu.memory_space<vmem>>, vector<1x1x8x32xbf16>
    %3 = vector.shape_cast %2 : vector<1x1x8x32xbf16> to vector<1x8x32xbf16>
    "tpu.trace_start"() <{level = 10 : i32, message = "gpd,gqd->gpq"}> : () -> ()
    %cst = arith.constant dense<0.000000e+00> : vector<1x8x8xf32>
    %4 = tpu.matmul %1, %3, %cst {dimension_numbers = #tpu.dot_dimension_numbers<[2], [2], [1], [1], [0, 0, 0, 1, 1, 1], [0], [0]>} : vector<1x8x32xbf16>, vector<1x8x32xbf16>, vector<1x8x8xf32> -> vector<1x8x8xf32>
    "tpu.trace_stop"() : () -> ()
    %5 = tpu.iota {dimensions = array<i32: 1>} : vector<1x8x8xi32>
    %6 = tpu.iota {dimensions = array<i32: 2>} : vector<1x8x8xi32>
    %7 = arith.cmpi eq, %5, %6 : vector<1x8x8xi32>
    %cst_7 = arith.constant 0.000000e+00 : f32
    %8 = vector.broadcast %cst_7 : f32 to vector<1x8x8xf32>
    %9 = arith.select %7, %4, %8 : vector<1x8x8xi1>, vector<1x8x8xf32>
    %cst_8 = arith.constant dense<0.000000e+00> : vector<1x8xf32>
    %10 = vector.multi_reduction <add>, %9, %cst_8 [2] : vector<1x8x8xf32> to vector<1x8xf32>
    %11 = vector.shape_cast %10 : vector<1x8xf32> to vector<1x8x1xf32>
    %cst_9 = arith.constant -1.000000e+01 : f32
    %12 = vector.broadcast %cst_9 : f32 to vector<1x8x8xf32>
    %13 = arith.select %7, %12, %4 : vector<1x8x8xi1>, vector<1x8x8xf32>
    %cst_10 = arith.constant 14.2857141 : f32
    %14 = vector.broadcast %cst_10 : f32 to vector<1x8x1xf32>
    %15 = arith.mulf %11, %14 : vector<1x8x1xf32>
    %cst_11 = arith.constant 14.2857141 : f32
    %16 = vector.broadcast %cst_11 : f32 to vector<1x8x8xf32>
    %17 = arith.mulf %13, %16 : vector<1x8x8xf32>
    %cst_12 = arith.constant dense<0xFF800000> : vector<1x8xf32>
    %18 = vector.multi_reduction <maximumf>, %17, %cst_12 [2] : vector<1x8x8xf32> to vector<1x8xf32>
    %19 = vector.shape_cast %18 : vector<1x8xf32> to vector<1x8x1xf32>
    %20 = arith.maximumf %15, %19 : vector<1x8x1xf32>
    %21 = arith.subf %15, %20 : vector<1x8x1xf32>
    %22 = math.exp %21 : vector<1x8x1xf32>
    %23 = vector.broadcast %20 : vector<1x8x1xf32> to vector<1x8x8xf32>
    %24 = arith.subf %17, %23 : vector<1x8x8xf32>
    %25 = math.exp %24 : vector<1x8x8xf32>
    %cst_13 = arith.constant dense<0.000000e+00> : vector<1x8xf32>
    %26 = vector.multi_reduction <add>, %25, %cst_13 [2] : vector<1x8x8xf32> to vector<1x8xf32>
    %27 = vector.shape_cast %26 : vector<1x8xf32> to vector<1x8x1xf32>
    %28 = arith.addf %22, %27 : vector<1x8x1xf32>
    %29 = math.log %28 : vector<1x8x1xf32>
    %30 = arith.addf %20, %29 : vector<1x8x1xf32>
    %31 = arith.subf %30, %15 : vector<1x8x1xf32>
    %32 = vector.shape_cast %31 : vector<1x8x1xf32> to vector<1x8xf32>
    %c0_14 = arith.constant 0 : index
    %c0_15 = arith.constant 0 : index
    %c0_16 = arith.constant 0 : index
    %33 = vector.load %arg3[%c0_14, %c0_15, %c0_16] : memref<1x1x8xf32, #tpu.memory_space<vmem>>, vector<1x1x8xf32>
    %34 = vector.shape_cast %33 : vector<1x1x8xf32> to vector<1x8xf32>
    %35 = vector.shape_cast %32 : vector<1x8xf32> to vector<1x1x8xf32>
    tpu.vector_store %arg3[%c0_14, %c0_15, %c0_16], %35 {strides = array<i32>} : memref<1x1x8xf32, #tpu.memory_space<vmem>>, vector<1x1x8xf32>,
    return
  }
  func.func @transform_0(%arg0: i32) -> (i32, i32, i32, i32) {
    %c0_i32 = arith.constant 0 : i32
    %c0_i32_0 = arith.constant 0 : i32
    %c0_i32_1 = arith.constant 0 : i32
    %c0_i32_2 = arith.constant 0 : i32
    return %arg0, %c0_i32, %c0_i32_0, %c0_i32_1 : i32, i32, i32, i32
  }
  func.func @transform_1(%arg0: i32) -> (i32, i32, i32, i32) {
    %c0_i32 = arith.constant 0 : i32
    %c0_i32_0 = arith.constant 0 : i32
    %c0_i32_1 = arith.constant 0 : i32
    %c0_i32_2 = arith.constant 0 : i32
    return %arg0, %c0_i32, %c0_i32_0, %c0_i32_1 : i32, i32, i32, i32
  }
  func.func @transform_2(%arg0: i32) -> (i32, i32, i32) {
    %c0_i32 = arith.constant 0 : i32
    %c0_i32_0 = arith.constant 0 : i32
    %c0_i32_1 = arith.constant 0 : i32
    return %arg0, %c0_i32, %c0_i32_0 : i32, i32, i32
  }
}

</mosaic_0001>

<bundles_post_ra>
// kernel: tpu_custom_call.1
= control target key start
LH: loop header
LB: loop body
LE: loop exit
PB: predicated region body
PF: predicated region fallthrough
CT: control target
= control target key end

     0   :  { %7 = vsyncpa [#allocation3], 0  ;;  %s832_s0 = inlined_call_operand.hbm [shape: bf16[2,1,8,32], index: 0, kind: input, shape index: {}]   ;;  %s833_s1 = inlined_call_operand.hbm [shape: bf16[2,1,8,32], index: 1, kind: input, shape index: {}]   ;;  %s834_s2 = inlined_call_operand.hbm [shape: f32[2,1,8], index: 2, kind: output, shape index: {}]  }
   0x1   :  { %9 = vsyncpa [#allocation3 + $0x1], 0 }
   0x2   :  { %10 = vsyncpa [#allocation6], 0 }
   0x3   :  { %12 = vsyncpa [#allocation6 + $0x1], 0 }
   0x4   :  { %13 = vsyncpa [#allocation4], 0 }
   0x5   :  { %15 = vsyncpa [#allocation4 + $0x1], 0  ;;  %s619_s9 = smov 0   ;;  %s621_s10 = smov 0  }
   0x6   :  { %s623_s11 = smov 0   ;;  %s625_s12 = smov 0  }
   0x7 LB: > { %s640_s13 = sadd.s32 4294967295, %s597_s12   ;;  %s386_s14 = sadd.s32 4294967294, %s597_s12   ;;  %s597_s12 = sphi %s625_s12, %s853_s12   ;;  %s593_s11 = sphi %s623_s11, %s852_s11   ;;  %s589_s10 = sphi %s621_s10, %s851_s10   ;;  %s585_s9 = sphi %s619_s9, %s850_s9  }
   0x8   : > { %s644_s15 = sadd.s32 1, %s597_s12   ;;  %s28_s16 = sadd.s32 1, %s593_s11 }
   0x9   : > { %s25_s17 = ssub.s32 %s597_s12, %s644_s15  ;;  %p35_p0 = scmp.ne.s32.totalorder %s593_s11, %s589_s10 }
   0xa   : > { %p26_p1 = scmp.eq.s32.totalorder %s25_s17, 0  ;;  %p36_p2 = scmp.eq.s32.totalorder %s597_s12, 0 }
   0xb   : > { %p41_p3 = scmp.ne.s32.totalorder %s589_s10, %s585_s9  ;;  %p42_p4 = scmp.eq.s32.totalorder %s640_s13, 0 }
   0xc   : > { %s656_s18 = scalar_select %p26_p1, %s593_s11, %s28_s16  }
   0xd   : > { %p658_p5 = por %p36_p2, %p35_p0  ;;  %p662_p6 = por %p42_p4, %p41_p3 }
   0xe   : > { %p91_p7 = scmp.eq.s32.totalorder %s640_s13, 1  ;;  %p97_p8 = scmp.eq.s32.totalorder %s386_s14, 1 }
   0xf   : > { %s838_s20 = scalar_select %p662_p6, 1, 0 }
  0x10   : > { %p425_p10 = scmp.lt.s32.totalorder %s597_s12, 2  ;;  %p669_p11 = por %p91_p7, %p35_p0 }
  0x11   : > { %p673_p12 = por %p97_p8, %p41_p3  ;;  %s678_s23 = sand.u32 1, %s593_s11  }
  0x12   : > { %s839_s21 = scalar_select %p669_p11, 1, 0 }
  0x13   : > { %s840_s22 = scalar_select %p673_p12, 1, 0 }
  0x14   : > { %s390_s24 = sshll.u32 %s597_s12, 6  ;;  %s389_s25 = sshll.u32 %s678_s23, 2 }
  0x15   : > { %s687_s28 = scalar_lea.hbm %s832_s0, %s390_s24  ;;  %s121_s29 = scalar_lea.vmem [#allocation2], %s389_s25 }
  0x16   : > { %s128_s30 = sshll.u32 %s121_s29, 4  ;;  %p693_p13 = pnand %p425_p10, %p658_p5  ;;  %s697_s30 = int_to_ptr.vmem [resolvable:$true] %s128_s30 }
  0x17   : > { %s118_s4 = scalar_lea.sflag [#allocation3], %s678_s23  ;;  %s467_s5 = scalar_lea.hbm %s687_s28, 64 }
  0x18   : > { %p468_p2 = scmp.ne.s32.totalorder %s687_s28, %s467_s5  ;;  %p469_p3 = pneg %p693_p13 }
  0x19   : > { %s472_s8 = scalar_lea.hbm %s832_s0, 128  ;;  %p473_p5 = scmp.lt.u32.totalorder %s687_s28, %s832_s0 }
  0x1a   : > { %p470_p4 = pnand %p469_p3, %p468_p2  ;;  %p474_p8 = scmp.lt.u32.totalorder %s472_s8, %s467_s5 }
  0x1b   : > { %p476_p9 = scmp.lt.u32.totalorder %s467_s5, %s687_s28 }
  0x1c   : > { %p471_p7 = pneg %p470_p4  ;;  %p475_p10 = por %p474_p8, %p473_p5 }
  0x1e   : > { %p477_p0 = por %p476_p9, %p475_p10 }
  0x20   : > { %p478_p1 = pnand %p477_p0, %p471_p7 }
  0x22   : > { %481 = shalt.err (!%p478_p1)
}
  0x23   : > { %s482_s17 = scalar_lea.vmem %s697_s30, 64  ;;  %s599_s19 = smov [#allocation2]  }
  0x24   : > { %p483_p2 = scmp.ne.s32.totalorder %s697_s30, %s482_s17  ;;  %s487_s26 = sshll.u32 %s599_s19, 4  ;;  %s488_s26 = int_to_ptr.vmem [resolvable:$false] %s487_s26 }
  0x25   : > { %s489_s27 = scalar_lea.vmem %s488_s26, 128  ;;  %p490_p11 = scmp.lt.s32.totalorder %s697_s30, %s488_s26 }
  0x26   : > { %p485_p4 = pnand %p483_p2, %p469_p3  ;;  %p491_p5 = scmp.lt.s32.totalorder %s489_s27, %s482_s17 }
  0x28   : > { %p486_p12 = pneg %p485_p4  ;;  %p492_p8 = por %p491_p5, %p490_p11 }
  0x2a   : > { %p493_p9 = pnand %p492_p8, %p486_p12 }
  0x2c   : > { %496 = shalt.err (!%p493_p9)
}
  0x2d   : > { %417 = dma.hbm_to_vmem [thread:$0]  (!%p693_p13), %s687_s28, 64, %s697_s30, %s118_s4  }
  0x2e   : > { %p842_p0 = scmp.lt.s32.totalorder %s597_s12, 3  ;;  %p843_p1 = scmp.ge.s32.totalorder %s597_s12, 1 }
  0x2f   : > { %s740_s7 = scalar_lea.hbm %s833_s1, %s390_s24  ;;  %s139_s8 = scalar_lea.vmem [#allocation5], %s389_s25 }
  0x30   : > { %p731_p7 = pnand %p843_p1, %p842_p0  ;;  %s146_s14 = sshll.u32 %s139_s8, 4  ;;  %s147_s14 = int_to_ptr.vmem [resolvable:$true] %s146_s14 }
  0x31   : > { %s136_s28 = scalar_lea.sflag [#allocation6], %s678_s23  ;;  %s497_s30 = scalar_lea.hbm %s740_s7, 64 }
  0x32   : > { %s844_s29 = scalar_select %p731_p7, 1, 0 }
  0x33   : > { %p498_p11 = scmp.ne.s32.totalorder %s740_s7, %s497_s30  ;;  %s502_s24 = scalar_lea.hbm %s833_s1, 128 }
  0x34   : > { %p503_p2 = scmp.lt.u32.totalorder %s740_s7, %s833_s1  ;;  %p504_p4 = scmp.lt.u32.totalorder %s502_s24, %s497_s30 }
  0x35   : > { %p500_p12 = pnand %p498_p11, %p469_p3  ;;  %p506_p8 = scmp.lt.u32.totalorder %s497_s30, %s740_s7 }
  0x36   : > { %p505_p5 = por %p504_p4, %p503_p2 }
  0x37   : > { %p501_p10 = pneg %p500_p12 }
  0x38   : > { %p507_p9 = por %p506_p8, %p505_p5 }
  0x3a   : > { %p508_p0 = pnand %p507_p9, %p501_p10 }
  0x3c   : > { %511 = shalt.err (!%p508_p0)
}
  0x3d   : > { %s512_s23 = scalar_lea.vmem %s147_s14, 64  ;;  %s600_s25 = smov [#allocation5]  }
  0x3e   : > { %p513_p1 = scmp.ne.s32.totalorder %s147_s14, %s512_s23  ;;  %s517_s26 = sshll.u32 %s600_s25, 4  ;;  %s518_s26 = int_to_ptr.vmem [resolvable:$false] %s517_s26 }
  0x3f   : > { %s519_s27 = scalar_lea.vmem %s518_s26, 128  ;;  %p520_p6 = scmp.lt.s32.totalorder %s147_s14, %s518_s26 }
  0x40   : > { %p515_p11 = pnand %p513_p1, %p469_p3  ;;  %p521_p7 = scmp.lt.s32.totalorder %s519_s27, %s512_s23 }
  0x42   : > { %p516_p12 = pneg %p515_p11  ;;  %p522_p2 = por %p521_p7, %p520_p6 }
  0x44   : > { %p523_p4 = pnand %p522_p2, %p516_p12 }
  0x46   : > { %526 = shalt.err (!%p523_p4)
}
  0x47   : > { %420 = dma.hbm_to_vmem [thread:$0]  (!%p693_p13), %s740_s7, 64, %s147_s14, %s136_s28  }
  0x48   : > { %p845_p10 = scmp.ne.s32.totalorder %s844_s29, 0 }
  0x49   : > { %s767_s5 = sand.u32 (!%p845_p10), 1, %s589_s10   ;;  %p846_p3 = scmp.ne.s32.totalorder (!%p845_p10), %s838_s20, 0 }
  0x4a   : > { %155 = sbr.rel (%p845_p10) target bundleno = 648 (0x288), region = 28  ;;  %s394_s6 = sshll.u32 (!%p845_p10), %s767_s5, 2 }
  0x4b   : > { %s158_s8 = scalar_lea.sflag (!%p845_p10), [#allocation3], %s767_s5  ;;  %s161_s30 = scalar_lea.vmem (!%p845_p10), [#allocation2], %s394_s6 }
  0x51   : > { %572 = dma.done.wait (%p846_p3), %s158_s8, 64  }
  0x52   : > { %574 = vsyncadd (%p846_p3), %s158_s8, 4294967232  ;;  %s167_s3 = scalar_lea.sflag [#allocation6], %s767_s5  ;;  %s170_s7 = scalar_lea.vmem [#allocation5], %s394_s6 }
  0x53   : > { %576 = dma.done.wait (%p846_p3), %s167_s3, 64  }
  0x54   : > { %578 = vsyncadd (%p846_p3), %s167_s3, 4294967232  ;;  %v601_v0 = vmov 0.0   ;;  %vm602_vm0 = vmmov 0   ;;  %vm198_vm1 = vcmask 261120   ;;  %v197_v1 = vld [vmem:[%s170_s7] sm:$0xf]  ;;  %v245_v4 = vlaneseq }
  0x55   : > { %402 = vmatprep.subr.bf16.mxu0 %v601_v0  ;;  %404 = vmatprep.mubr.msk.bf16.mxu0 %vm602_vm0, %v601_v0  ;;  %v203_v2 = vsel %vm198_vm1, %v197_v1, 0  ;;  %v196_v3 = vld [vmem:[%s161_s30] sm:$0xf]  ;;  %vm251_vm3 = vcmask 64512   ;;  %s397_s20 = sshll.u32 %s640_s13, 4  ;;  %s194_s29 = scalar_lea.vmem [#allocation7], %s767_s5 }
  0x56   : > { %403 = vmatpush3.bf16.xpose.msra.mxu0 %v203_v2  ;;  %v246_v5 = vshrl.u32 %v245_v4, 7  ;;  %v248_v6 = vand.u32 127, %v245_v4  ;;  %s297_s14 = sshll.u32 %s194_s29, 4  ;;  %vm282_vm4 = vcmask 57344   ;;  %s788_s16 = scalar_lea.hbm %s834_s2, %s397_s20  ;;  %s790_s14 = int_to_ptr.vmem [resolvable:$true] %s297_s14 }
  0x57   : > { %s285_s24 = scalar_lea.sflag [#allocation4], %s767_s5  ;;  %s527_s17 = scalar_lea.vmem %s790_s14, 16 }
  0x58   : > { %v279_v7 = vsub.s32 %v248_v6, %v246_v5  ;;  %vm249_vm2 = vcmp.eq.s32.totalorder %v246_v5, %v248_v6  ;;  %p528_p6 = scmp.ne.s32.totalorder %s790_s14, %s527_s17  ;;  %p847_p13 = scmp.ne.s32.totalorder %s839_s21, 0 }
  0x59   : > { %s603_s13 = smov [#allocation7]  }
  0x5a   : > { %p529_p7 = pnand %p528_p6, %p847_p13  ;;  %s531_s19 = sshll.u32 %s603_s13, 4  ;;  %s532_s19 = int_to_ptr.vmem [resolvable:$false] %s531_s19 }
  0x5b   : > { %s533_s23 = scalar_lea.vmem %s532_s19, 32  ;;  %p534_p8 = scmp.lt.s32.totalorder %s790_s14, %s532_s19 }
  0x5c   : > { %p530_p5 = pneg %p529_p7  ;;  %p535_p9 = scmp.lt.s32.totalorder %s533_s23, %s527_s17 }
  0x5d   : > { %405 = vmatmul.mubr.msk.bf16.vlgmr.msra.gmra.mrb[0].mxu0 %vm198_vm1, %v196_v3 }
  0x5e   : > { %p536_p0 = por %p535_p9, %p534_p8 }
  0x60   : > { %p537_p1 = pnand %p536_p0, %p530_p5 }
 0x130   : > { %v239_v8 = vpop.f32.mrb[0].mxu0 }
 0x131   : > { %v255_v9 = vsel %vm249_vm2, -10.0, %v239_v8  ;;  %v406_v10 = vpop.f32.mrb[1].mxu0  ;;  %v250_v11 = vsel %vm249_vm2, %v239_v8, 0.0 }
 0x132   : > { %v257_v12 = vmul.f32 14.285714, %v255_v9  ;;  %v242_v13 = vpop.f32.mrb[2].mxu0  ;;  %v252_v14 = vsel %vm251_vm3, %v250_v11, 0.0 }
 0x133   : > { %253 = vadd.xlane.f32.xlu0 %v252_v14  ;;  %v407_v15 = vpop.f32.mrb[3].mxu0 }
 0x134   : > { %v258_v16 = vsel %vm251_vm3, %v257_v12, -inf }
 0x137   : > { %259 = vmax.xlane.f32.xlu0 %v258_v16 }
 0x1c0   : > { %v254_v17 = vpop.xlane.xlu0 %253 }
 0x1c1   : > { %v256_v18 = vmul.f32 14.285714, %v254_v17 }
 0x1c4   : > { %v260_v19 = vpop.xlane.xlu0 %259 }
 0x1c5   : > { %v261_v20 = vmax.f32 %v256_v18, %v260_v19 }
 0x1c7   : > { %v265_v21 = vsub.f32 %v257_v12, %v261_v20  ;;  %v262_v25 = vsub.f32 %v256_v18, %v261_v20 }
 0x1c9   : > { %v266_v22 = vmul.f32 1.442695, %v265_v21  ;;  %v263_v26 = vmul.f32 1.442695, %v262_v25 }
 0x1cb   : > { %461 = vpow2.f32 %v266_v22 }
 0x1cc   : > { %463 = vpow2.f32 %v263_v26 }
 0x1d5   : > { %v462_v23 = vpop.eup %461 }
 0x1d6   : > { %v268_v24 = vsel %vm251_vm3, %v462_v23, 0.0  ;;  %v464_v27 = vpop.eup %463 }
 0x1d7   : > { %269 = vadd.xlane.f32.xlu1 %v268_v24 }
 0x264   : > { %v270_v28 = vpop.xlane.xlu1 %269 }
 0x265   : > { %v271_v29 = vadd.f32 %v464_v27, %v270_v28 }
 0x267   : > { %465 = vlog2.f32 %v271_v29 }
 0x271   : > { %v466_v30 = vpop.eup %465 }
 0x272   : > { %v273_v31 = vmul.f32 0.6931472, %v466_v30 }
 0x274   : > { %v274_v32 = vadd.f32 %v273_v31, %v261_v20 }
 0x276   : > { %v275_v33 = vsub.f32 %v274_v32, %v256_v18 }
 0x278   : > { %v280_v34 = vrot.slane %v275_v33, %v279_v7 }
 0x27a   : > { %283 = vst.msk [vmem:[%s194_s29] sm:$0x1] %vm282_vm4, %v280_v34 }
 0x27b   : > { %540 = shalt.err (!%p537_p1)
}
 0x27c   : > { %s541_s25 = scalar_lea.hbm %s788_s16, 16  ;;  %s545_s5 = scalar_lea.hbm %s834_s2, 32 }
 0x27d   : > { %p542_p11 = scmp.ne.s32.totalorder %s788_s16, %s541_s25  ;;  %p546_p4 = scmp.lt.u32.totalorder %s788_s16, %s834_s2 }
 0x27e   : > { %p547_p10 = scmp.lt.u32.totalorder %s545_s5, %s541_s25  ;;  %p549_p6 = scmp.lt.u32.totalorder %s541_s25, %s788_s16 }
 0x27f   : > { %p543_p12 = pnand %p542_p11, %p847_p13 }
 0x280   : > { %p548_p3 = por %p547_p10, %p546_p4 }
 0x281   : > { %p544_p2 = pneg %p543_p12 }
 0x282   : > { %p550_p7 = por %p549_p6, %p548_p3 }
 0x284   : > { %p551_p5 = pnand %p550_p7, %p544_p2 }
 0x286   : > { %554 = shalt.err (!%p551_p5)
}
 0x287   : > { %412 = dma.vmem_to_hbm [thread:$0]  (%p847_p13), %s790_s14, 16, %s788_s16, %s285_s24  }
 0x288 PF: > { %s309_s30 = sand.u32 1, %s585_s9   ;;  %p848_p8 = scmp.ne.s32.totalorder %s840_s22, 0 }
 0x289   : > { %p849_p9 = scmp.ge.s32.totalorder %s597_s12, 2  ;;  %s310_s3 = scalar_lea.sflag [#allocation4], %s309_s30 }
 0x28b   : > { %p422_p0 = pnand %p849_p9, %p848_p8 }
 0x28d   : > { %580 = dma.done.wait (!%p422_p0), %s310_s3, 16  }
 0x28e   : > { %582 = vsyncadd (!%p422_p0), %s310_s3, 4294967280  ;;  %p18_p1 = scmp.ge.s32.totalorder %s644_s15, 4   ;;  %s850_s9 = smov %s589_s10 }
 0x28f   : > { %s851_s10 = smov %s593_s11  ;;  %s852_s11 = smov %s656_s18 }
 0x290   : > { %s853_s12 = smov %s644_s15  ;;  %20 = sbr.rel (!%p18_p1) target bundleno = 7 (0x7), region = 86 }
 0x297   :  { %314 = vsyncpa [#allocation3], 1 }
 0x298   :  { %316 = vsyncpa [#allocation3 + $0x1], 1 }
 0x299   :  { %317 = vsyncpa [#allocation6], 1 }
 0x29a   :  { %319 = vsyncpa [#allocation6 + $0x1], 1 }
 0x29b   :  { %320 = vsyncpa [#allocation4], 1 }
 0x29c   :  { %322 = vsyncpa [#allocation4 + $0x1], 1 }

</bundles_post_ra>
